<compile_context>
chip_gen: v5e
topology: v5e:2x2
jax: 0.10.0
libtpu: 0.0.40
codegen_flags: <defaults>
</compile_context>

<pallas_src>
import functools

import jax
import jax.numpy as jnp
from jax.experimental import pallas as pl
from jax.experimental.pallas import tpu as pltpu

LANE = 128


def _round_up(x, m):
    return (x + m - 1) // m * m


def mlp_kernel(x_ref, w_in_ref, b_in_ref, w_mid_ref, b_mid_ref,
               w_out_ref, b_out_ref, o_ref, *, num_hidden_layers):
    # Hoist bias loads/broadcasts out of the unrolled loop (JAX doesn't CSE
    # broadcast_in_dim; reloading per layer would re-emit vld + broadcast).
    b_in = b_in_ref[...].astype(jnp.float32)
    b_mid = b_mid_ref[...].astype(jnp.float32)
    b_out = b_out_ref[...].astype(jnp.float32)
    w_mid = w_mid_ref[...]

    # fc_input + ReLU  (MXU matmul, f32 accumulation)
    h = jnp.dot(x_ref[...], w_in_ref[...],
                preferred_element_type=jnp.float32) + b_in
    h = jnp.maximum(h, 0.0)

    # num_hidden_layers applications of the shared-weight middle layer + ReLU.
    # Python unroll is fine at small depth; for deep stacks switch to
    # lax.fori_loop(..., unroll=True) to bound code size / vreg live ranges.
    for _ in range(num_hidden_layers):
        h = jnp.dot(h.astype(w_mid.dtype), w_mid,
                    preferred_element_type=jnp.float32) + b_mid
        h = jnp.maximum(h, 0.0)

    # fc_out (no activation) into the lane-dense (padded to 128-wide) slab.
    y = jnp.dot(h.astype(w_out_ref.dtype), w_out_ref[...],
                preferred_element_type=jnp.float32) + b_out
    o_ref[...] = y.astype(o_ref.dtype)


def mlp_forward(x, params, num_hidden_layers, *, tile_b=512):
    """x: (B, input_size); weights stored as (in_features, out_features)."""
    w_in, b_in, w_mid, b_mid, w_out, b_out = params
    B, in_features = x.shape
    num_units = w_mid.shape[0]
    num_classes = w_out.shape[1]

    # --- lane-dense output: zero-pad the output width to a multiple of 128 ---
    n_pad = _round_up(num_classes, LANE)
    w_out_p = jnp.zeros((num_units, n_pad), w_out.dtype).at[:, :num_classes].set(w_out)
    b_out_p = jnp.zeros((1, n_pad), b_out.dtype).at[:, :num_classes].set(b_out)

    # --- batch tiling: large tiles amortize the ~0.35 us/step pipeline cost ---
    tile_b = max(8, min(tile_b, _round_up(B, 8)))   # multiple of 8 sublanes
    B_pad = _round_up(B, tile_b)
    if B_pad != B:
        x = jnp.concatenate(
            [x, jnp.zeros((B_pad - B, in_features), x.dtype)], axis=0)
    grid = (B_pad // tile_b,)

    act_spec = pl.BlockSpec((tile_b, in_features), lambda i: (i, 0))
    out_spec = pl.BlockSpec((tile_b, n_pad), lambda i: (i, 0))
    # Weights / biases: same block for every grid step -> stay VMEM-resident.
    resident = lambda shape: pl.BlockSpec(shape, lambda i: (0,) * len(shape))

    itemsize = jnp.dtype(x.dtype).itemsize
    flops = 2 * B_pad * (in_features * num_units
                         + num_hidden_layers * num_units * num_units
                         + num_units * n_pad)
    bytes_accessed = (
        B_pad * in_features * itemsize                       # x in
        + (w_in.size + b_in.size + w_mid.size + b_mid.size
           + w_out_p.size + b_out_p.size) * itemsize         # params in
        + B_pad * n_pad * itemsize)                          # out

    out_padded = pl.pallas_call(
        functools.partial(mlp_kernel, num_hidden_layers=num_hidden_layers),
        out_shape=jax.ShapeDtypeStruct((B_pad, n_pad), x.dtype),
        grid=grid,
        in_specs=[act_spec,
                  resident(w_in.shape), resident(b_in.shape),
                  resident(w_mid.shape), resident(b_mid.shape),
                  resident(w_out_p.shape), resident(b_out_p.shape)],
        out_specs=out_spec,
        compiler_params=pltpu.CompilerParams(
            dimension_semantics=("parallel",),        # shard batch across TCs (v7x)
            vmem_limit_bytes=32 * 1024 * 1024),       # raise v5e's 16 MiB default
        cost_estimate=pl.CostEstimate(
            flops=flops, transcendentals=0, bytes_accessed=bytes_accessed),
    )(x, w_in, b_in, w_mid, b_mid, w_out_p, b_out_p)

    # Slice back to the real batch / class counts (layout-only padding).
    return out_padded[:B, :num_classes]


def init_linear(key, in_features, out_features, dtype=jnp.float32):
    """PyTorch nn.Linear default init: U(-1/sqrt(fan_in), 1/sqrt(fan_in)).
    Weight stored as (in_features, out_features) so the kernel computes
    y = x @ W + b directly on the MXU."""
    kw, kb = jax.random.split(key)
    bound = 1.0 / jnp.sqrt(jnp.asarray(in_features, dtype))
    w = jax.random.uniform(kw, (in_features, out_features), dtype,
                           minval=-bound, maxval=bound)
    b = jax.random.uniform(kb, (1, out_features), dtype,
                           minval=-bound, maxval=bound)
    return w, b


def mlp_reference(x, params, num_hidden_layers):
    w_in, b_in, w_mid, b_mid, w_out, b_out = params
    h = jax.nn.relu(x @ w_in + b_in)
    for _ in range(num_hidden_layers):
        h = jax.nn.relu(h @ w_mid + b_mid)
    return h @ w_out + b_out


if __name__ == "__main__":
    # Small shapes consistent with the module's forward.
    batch = 8
    input_size = 32
    num_hidden_layers = 2
    num_units = 64
    num_classes = 10

    key = jax.random.PRNGKey(0)
    k_x, k_in, k_mid, k_out = jax.random.split(key, 4)

    x = jax.random.normal(k_x, (batch, input_size), jnp.float32)

    w_in, b_in = init_linear(k_in, input_size, num_units)
    w_mid, b_mid = init_linear(k_mid, num_units, num_units)
    w_out, b_out = init_linear(k_out, num_units, num_classes)
    params = (w_in, b_in, w_mid, b_mid, w_out, b_out)
    # TODO(synk): at production widths, store params as bf16 (MXU-native on
    # v5e/v6e/v7x) and tile the K axis for v7x's 64 MiB VMEM.

    out = mlp_forward(x, params, num_hidden_layers)
    out = jax.block_until_ready(out)

    ref = mlp_reference(x, params, num_hidden_layers)
    assert out.shape == (batch, num_classes)
    assert jnp.allclose(out, ref, atol=1e-5, rtol=1e-5), "mismatch vs reference"

    print("KERNEL_OK")
</pallas_src>

<mosaic_0001>
module attributes {stable_mosaic.version = 11 : i64} {
  func.func @mlp_kernel(%arg0: i32, %arg1: memref<8x32xf32, #tpu.memory_space<vmem>>, %arg2: memref<32x64xf32, #tpu.memory_space<vmem>>, %arg3: memref<1x64xf32, #tpu.memory_space<vmem>>, %arg4: memref<64x64xf32, #tpu.memory_space<vmem>>, %arg5: memref<1x64xf32, #tpu.memory_space<vmem>>, %arg6: memref<64x128xf32, #tpu.memory_space<vmem>>, %arg7: memref<1x128xf32, #tpu.memory_space<vmem>>, %arg8: memref<8x128xf32, #tpu.memory_space<vmem>>) attributes {dimension_semantics = [#tpu.dimension_semantics<parallel>], iteration_bounds = array<i64: 1>, scalar_prefetch = 0 : i64, scratch_operands = 0 : i64, tpu.core_type = #tpu.core_type<tc>, window_params = [{transform_indices = @transform_0, window_bounds = array<i64: 8, 32>}, {pipeline_mode = #tpu.pipeline_mode<synchronous>, transform_indices = @transform_1, window_bounds = array<i64: 32, 64>}, {pipeline_mode = #tpu.pipeline_mode<synchronous>, transform_indices = @transform_2, window_bounds = array<i64: 1, 64>}, {pipeline_mode = #tpu.pipeline_mode<synchronous>, transform_indices = @transform_3, window_bounds = array<i64: 64, 64>}, {pipeline_mode = #tpu.pipeline_mode<synchronous>, transform_indices = @transform_4, window_bounds = array<i64: 1, 64>}, {pipeline_mode = #tpu.pipeline_mode<synchronous>, transform_indices = @transform_5, window_bounds = array<i64: 64, 128>}, {pipeline_mode = #tpu.pipeline_mode<synchronous>, transform_indices = @transform_6, window_bounds = array<i64: 1, 128>}, {transform_indices = @transform_7, window_bounds = array<i64: 8, 128>}]} {
    %c0 = arith.constant 0 : index
    %c0_0 = arith.constant 0 : index
    %0 = vector.load %arg3[%c0, %c0_0] : memref<1x64xf32, #tpu.memory_space<vmem>>, vector<1x64xf32>
    %c0_1 = arith.constant 0 : index
    %c0_2 = arith.constant 0 : index
    %1 = vector.load %arg5[%c0_1, %c0_2] : memref<1x64xf32, #tpu.memory_space<vmem>>, vector<1x64xf32>
    %c0_3 = arith.constant 0 : index
    %c0_4 = arith.constant 0 : index
    %2 = vector.load %arg7[%c0_3, %c0_4] : memref<1x128xf32, #tpu.memory_space<vmem>>, vector<1x128xf32>
    %c0_5 = arith.constant 0 : index
    %c0_6 = arith.constant 0 : index
    %3 = vector.load %arg4[%c0_5, %c0_6] : memref<64x64xf32, #tpu.memory_space<vmem>>, vector<64x64xf32>
    %c0_7 = arith.constant 0 : index
    %c0_8 = arith.constant 0 : index
    %4 = vector.load %arg1[%c0_7, %c0_8] : memref<8x32xf32, #tpu.memory_space<vmem>>, vector<8x32xf32>
    %c0_9 = arith.constant 0 : index
    %c0_10 = arith.constant 0 : index
    %5 = vector.load %arg2[%c0_9, %c0_10] : memref<32x64xf32, #tpu.memory_space<vmem>>, vector<32x64xf32>
    %cst = arith.constant dense<0.000000e+00> : vector<8x64xf32>
    %6 = tpu.matmul %4, %5, %cst {dimension_numbers = #tpu.dot_dimension_numbers<[1], [0], [0], [1], [0, 0, 1, 1], [], []>} : vector<8x32xf32>, vector<32x64xf32>, vector<8x64xf32> -> vector<8x64xf32>
    %7 = vector.broadcast %0 : vector<1x64xf32> to vector<8x64xf32>
    %8 = arith.addf %6, %7 : vector<8x64xf32>
    %cst_11 = arith.constant 0.000000e+00 : f32
    %9 = vector.broadcast %cst_11 : f32 to vector<8x64xf32>
    %10 = arith.maximumf %8, %9 : vector<8x64xf32>
    %cst_12 = arith.constant dense<0.000000e+00> : vector<8x64xf32>
    %11 = tpu.matmul %10, %3, %cst_12 {dimension_numbers = #tpu.dot_dimension_numbers<[1], [0], [0], [1], [0, 0, 1, 1], [], []>} : vector<8x64xf32>, vector<64x64xf32>, vector<8x64xf32> -> vector<8x64xf32>
    %12 = vector.broadcast %1 : vector<1x64xf32> to vector<8x64xf32>
    %13 = arith.addf %11, %12 : vector<8x64xf32>
    %cst_13 = arith.constant 0.000000e+00 : f32
    %14 = vector.broadcast %cst_13 : f32 to vector<8x64xf32>
    %15 = arith.maximumf %13, %14 : vector<8x64xf32>
    %cst_14 = arith.constant dense<0.000000e+00> : vector<8x64xf32>
    %16 = tpu.matmul %15, %3, %cst_14 {dimension_numbers = #tpu.dot_dimension_numbers<[1], [0], [0], [1], [0, 0, 1, 1], [], []>} : vector<8x64xf32>, vector<64x64xf32>, vector<8x64xf32> -> vector<8x64xf32>
    %17 = vector.broadcast %1 : vector<1x64xf32> to vector<8x64xf32>
    %18 = arith.addf %16, %17 : vector<8x64xf32>
    %cst_15 = arith.constant 0.000000e+00 : f32
    %19 = vector.broadcast %cst_15 : f32 to vector<8x64xf32>
    %20 = arith.maximumf %18, %19 : vector<8x64xf32>
    %c0_16 = arith.constant 0 : index
    %c0_17 = arith.constant 0 : index
    %21 = vector.load %arg6[%c0_16, %c0_17] : memref<64x128xf32, #tpu.memory_space<vmem>>, vector<64x128xf32>
    %cst_18 = arith.constant dense<0.000000e+00> : vector<8x128xf32>
    %22 = tpu.matmul %20, %21, %cst_18 {dimension_numbers = #tpu.dot_dimension_numbers<[1], [0], [0], [1], [0, 0, 1, 1], [], []>} : vector<8x64xf32>, vector<64x128xf32>, vector<8x128xf32> -> vector<8x128xf32>
    %23 = vector.broadcast %2 : vector<1x128xf32> to vector<8x128xf32>
    %24 = arith.addf %22, %23 : vector<8x128xf32>
    %c0_19 = arith.constant 0 : index
    %c0_20 = arith.constant 0 : index
    %25 = vector.load %arg8[%c0_19, %c0_20] : memref<8x128xf32, #tpu.memory_space<vmem>>, vector<8x128xf32>
    tpu.vector_store %arg8[%c0_19, %c0_20], %24 {strides = array<i32>} : memref<8x128xf32, #tpu.memory_space<vmem>>, vector<8x128xf32>,
    return
  }
  func.func @transform_0(%arg0: i32) -> (i32, i32) {
    %c0_i32 = arith.constant 0 : i32
    %c0_i32_0 = arith.constant 0 : i32
    return %arg0, %c0_i32 : i32, i32
  }
  func.func @transform_1(%arg0: i32) -> (i32, i32) {
    %c0_i32 = arith.constant 0 : i32
    %c0_i32_0 = arith.constant 0 : i32
    %c0_i32_1 = arith.constant 0 : i32
    return %c0_i32, %c0_i32_0 : i32, i32
  }
  func.func @transform_2(%arg0: i32) -> (i32, i32) {
    %c0_i32 = arith.constant 0 : i32
    %c0_i32_0 = arith.constant 0 : i32
    %c0_i32_1 = arith.constant 0 : i32
    return %c0_i32, %c0_i32_0 : i32, i32
  }
  func.func @transform_3(%arg0: i32) -> (i32, i32) {
    %c0_i32 = arith.constant 0 : i32
    %c0_i32_0 = arith.constant 0 : i32
    %c0_i32_1 = arith.constant 0 : i32
    return %c0_i32, %c0_i32_0 : i32, i32
  }
  func.func @transform_4(%arg0: i32) -> (i32, i32) {
    %c0_i32 = arith.constant 0 : i32
    %c0_i32_0 = arith.constant 0 : i32
    %c0_i32_1 = arith.constant 0 : i32
    return %c0_i32, %c0_i32_0 : i32, i32
  }
  func.func @transform_5(%arg0: i32) -> (i32, i32) {
    %c0_i32 = arith.constant 0 : i32
    %c0_i32_0 = arith.constant 0 : i32
    %c0_i32_1 = arith.constant 0 : i32
    return %c0_i32, %c0_i32_0 : i32, i32
  }
  func.func @transform_6(%arg0: i32) -> (i32, i32) {
    %c0_i32 = arith.constant 0 : i32
    %c0_i32_0 = arith.constant 0 : i32
    %c0_i32_1 = arith.constant 0 : i32
    return %c0_i32, %c0_i32_0 : i32, i32
  }
  func.func @transform_7(%arg0: i32) -> (i32, i32) {
    %c0_i32 = arith.constant 0 : i32
    %c0_i32_0 = arith.constant 0 : i32
    return %arg0, %c0_i32 : i32, i32
  }
}

</mosaic_0001>

<bundles_post_ra>
// kernel: tpu_custom_call.1
= control target key start
LH: loop header
LB: loop body
LE: loop exit
PB: predicated region body
PF: predicated region fallthrough
CT: control target
= control target key end

     0   :  { %12 = vsyncpa [#allocation3], 0  ;;  %s454_s0 = inlined_call_operand.hbm [shape: f32[8,32], index: 0, kind: input, shape index: {}]   ;;  %s455_s1 = inlined_call_operand.hbm [shape: f32[32,64], index: 1, kind: input, shape index: {}]   ;;  %s456_s2 = inlined_call_operand.vmem [shape: f32[1,64], index: 2, kind: input, shape index: {}]   ;;  %s457_s3 = inlined_call_operand.hbm [shape: f32[64,64], index: 3, kind: input, shape index: {}]   ;;  %s458_s4 = inlined_call_operand.vmem [shape: f32[1,64], index: 4, kind: input, shape index: {}]   ;;  %s459_s5 = inlined_call_operand.hbm [shape: f32[64,128], index: 5, kind: input, shape index: {}]   ;;  %s460_s6 = inlined_call_operand.vmem [shape: f32[1,128], index: 6, kind: input, shape index: {}]   ;;  %s461_s7 = inlined_call_operand.hbm [shape: f32[8,128], index: 7, kind: output, shape index: {}]  }
   0x1   :  { %13 = vsyncpa [#allocation6], 0 }
   0x2   :  { %14 = vsyncpa [#allocation9], 0  ;;  %s31_s26 = sshll.u32 %s455_s1, 4  ;;  %s32_s26 = int_to_ptr.hbm [resolvable:$true] %s31_s26 }
   0x3   :  { %15 = vsyncpa [#allocation4], 0  ;;  %s380_s27 = smov [#allocation5]   ;;  %s21_s8 = sshll.u32 %s454_s0, 4  ;;  %s22_s8 = int_to_ptr.hbm [resolvable:$true] %s21_s8 }
   0x4   :  { %s33_s28 = sshll.u32 %s380_s27, 4  ;;  %s381_s9 = smov 128   ;;  %s34_s28 = int_to_ptr.vmem [resolvable:$true] %s33_s28 }
   0x5   :  { %s382_s10 = smov 8   ;;  %s383_s11 = smov [#allocation2]  }
   0x6   :  { %39 = dma.hbm_to_vmem [thread:$0]  %s32_s26, 512, %s34_s28, [#allocation6], %s381_s9, %s381_s9, %s382_s10  }
   0x7   :  { %s23_s12 = sshll.u32 %s383_s11, 4  ;;  %s46_s15 = sshll.u32 %s457_s3, 4  ;;  %s24_s12 = int_to_ptr.vmem [resolvable:$true] %s23_s12  ;;  %s47_s15 = int_to_ptr.hbm [resolvable:$true] %s46_s15 }
   0x8   :  { %26 = dma.hbm_to_vmem [thread:$0]  %s22_s8, 128, %s24_s12, [#allocation3]  }
   0x9   :  { %s61_s17 = sshll.u32 %s459_s5, 4  ;;  %s384_s18 = smov [#allocation7]   ;;  %s62_s17 = int_to_ptr.hbm [resolvable:$true] %s61_s17 }
   0xa   :  { %s48_s19 = sshll.u32 %s384_s18, 4  ;;  %s385_s0 = smov [#allocation8]   ;;  %s49_s19 = int_to_ptr.vmem [resolvable:$true] %s48_s19 }
   0xb   :  { %54 = dma.hbm_to_vmem [thread:$0]  %s47_s15, 1024, %s49_s19, [#allocation6], %s381_s9, %s381_s9, %s382_s10  }
   0xc   :  { %s63_s20 = sshll.u32 %s385_s0, 4  ;;  %s64_s20 = int_to_ptr.vmem [resolvable:$true] %s63_s20 }
   0xd   :  { %69 = dma.hbm_to_vmem [thread:$0]  %s62_s17, 1024, %s64_s20, [#allocation9], %s381_s9, %s381_s9, %s382_s10  }
   0xe   :  { %372 = dma.done.wait [#allocation3], 128  }
   0xf   :  { %373 = vsyncadd [#allocation3], 4294967168 }
  0x10   :  { %374 = dma.done.wait [#allocation6], 1536  }
  0x11   :  { %375 = vsyncadd [#allocation6], 4294965760 }
  0x12   :  { %376 = dma.done.wait [#allocation9], 1024  }
  0x13   :  { %377 = vsyncadd [#allocation9], 4294966272  ;;  %v103_v0 = vld [vmem:[#allocation5 + $0x18] sm:$0xff]  ;;  %v102_v1 = vld [vmem:[#allocation5 + $0x10] sm:$0xff]  ;;  %vm107_vm0 = vcmask 261120   ;;  %vm135_vm1 = vcmask 523264  }
  0x14   :  { %123 = vmatpush.msra.mxu0 %v103_v0  ;;  %v98_v2 = vld [vmem:[#allocation7 + $0x38] sm:$0xff]  ;;  %v101_v3 = vld [vmem:[#allocation5 + $0x8] sm:$0xff]  ;;  %v97_v4 = vld [vmem:[#allocation7 + $0x30] sm:$0xff]  ;;  %s226_s27 = sshll.u32 %s461_s7, 4  ;;  %s227_s27 = int_to_ptr.hbm [resolvable:$true] %s226_s27 }
  0x15   :  { %147 = vmatpush.msra.mxu1 %v98_v2  ;;  %171 = vmatpush.msra.mxu2 %v98_v2  ;;  %v96_v5 = vld [vmem:[#allocation7 + $0x28] sm:$0xff]  ;;  %v100_v6 = vld [vmem:[#allocation5] sm:$0xff]  ;;  %v99_v7 = vld [vmem:[#allocation2] sm:$0xff] }
  0x16   :  { %124 = vmatpush.msra.mxu0 %v102_v1  ;;  %v95_v8 = vld [vmem:[#allocation7 + $0x20] sm:$0xff]  ;;  %v94_v9 = vld [vmem:[#allocation7 + $0x18] sm:$0xff]  ;;  %v93_v10 = vld [vmem:[#allocation7 + $0x10] sm:$0xff] }
  0x17   :  { %148 = vmatpush.msra.mxu1 %v97_v4  ;;  %172 = vmatpush.msra.mxu2 %v97_v4  ;;  %v92_v11 = vld [vmem:[#allocation7 + $0x8] sm:$0xff]  ;;  %v91_v12 = vld [vmem:[#allocation7] sm:$0xff]  ;;  %v249_v13 = vld [vmem:[%s456_s2] ss:$0 sm:$0xff] }
  0x18   :  { %125 = vmatpush.msra.mxu0 %v101_v3  ;;  %v191_v17 = vld [vmem:[#allocation8 + $0x38] sm:$0xff]  ;;  %v190_v18 = vld [vmem:[#allocation8 + $0x30] sm:$0xff]  ;;  %v189_v19 = vld [vmem:[#allocation8 + $0x28] sm:$0xff] }
  0x19   :  { %149 = vmatpush.msra.mxu1 %v96_v5  ;;  %173 = vmatpush.msra.mxu2 %v96_v5  ;;  %v188_v20 = vld [vmem:[#allocation8 + $0x20] sm:$0xff]  ;;  %v187_v21 = vld [vmem:[#allocation8 + $0x18] sm:$0xff]  ;;  %v186_v26 = vld [vmem:[#allocation8 + $0x10] sm:$0xff] }
  0x1a   :  { %126 = vmatpush.msra.mxu0 %v100_v6  ;;  %206 = vmatpush.msra.mxu3 %v191_v17  ;;  %v250_v22 = vld [vmem:[%s458_s4] ss:$0 sm:$0xff]  ;;  %v185_v27 = vld [vmem:[#allocation8 + $0x8] sm:$0xff]  ;;  %v184_v28 = vld [vmem:[#allocation8] sm:$0xff]  ;;  %s386_s4 = smov [#allocation10]  }
  0x1b   :  { %238 = vmatmul.msk.f32.vlgmr.msra.gmra.mxu0 %vm107_vm0, %v99_v7  ;;  %150 = vmatpush.msra.mxu1 %v95_v8  ;;  %v251_v32 = vld [vmem:[%s460_s6] ss:$0 sm:$0xff]  ;;  %s224_s24 = sshll.u32 %s386_s4, 4  ;;  %s225_s24 = int_to_ptr.vmem [resolvable:$true] %s224_s24 }
  0x1c   :  { %174 = vmatpush.msra.mxu2 %v95_v8  ;;  %207 = vmatpush.msra.mxu3 %v190_v18 }
  0x1d   :  { %151 = vmatpush.msra.mxu1 %v94_v9 }
  0x1e   :  { %175 = vmatpush.msra.mxu2 %v94_v9  ;;  %208 = vmatpush.msra.mxu3 %v189_v19 }
  0x1f   :  { %152 = vmatpush.msra.mxu1 %v93_v10 }
  0x20   :  { %176 = vmatpush.msra.mxu2 %v93_v10  ;;  %209 = vmatpush.msra.mxu3 %v188_v20 }
  0x21   :  { %153 = vmatpush.msra.mxu1 %v92_v11 }
  0x22   :  { %177 = vmatpush.msra.mxu2 %v92_v11  ;;  %210 = vmatpush.msra.mxu3 %v187_v21 }
  0x23   :  { %154 = vmatpush.msra.mxu1 %v91_v12 }
  0x24   :  { %178 = vmatpush.msra.mxu2 %v91_v12  ;;  %211 = vmatpush.msra.mxu3 %v186_v26 }
  0x26   :  { %212 = vmatpush.msra.mxu3 %v185_v27 }
  0x28   :  { %213 = vmatpush.msra.mxu3 %v184_v28 }
  0x98   :  { %v128_v14 = vpop.f32.mrf.mxu0 }
  0x99   :  { %v129_v15 = vadd.f32 %v249_v13, %v128_v14 }
  0x9b   :  { %v131_v16 = vmax.f32 %v129_v15, 0.0 }
  0x9d   :  { %239 = vmatmul.msk.f32.vlgmr.msra.gmra.mxu1 %vm135_vm1, %v131_v16 }
 0x11a   :  { %v156_v23 = vpop.f32.mrf.mxu1 }
 0x11b   :  { %v157_v24 = vadd.f32 %v250_v22, %v156_v23 }
 0x11d   :  { %v159_v25 = vmax.f32 %v157_v24, 0.0 }
 0x11f   :  { %240 = vmatmul.msk.f32.vlgmr.msra.gmra.mxu2 %vm135_vm1, %v159_v25 }
 0x1a2   :  { %v180_v29 = vpop.f32.mrf.mxu2 }
 0x1a3   :  { %v181_v30 = vadd.f32 %v250_v22, %v180_v29 }
 0x1a5   :  { %v183_v31 = vmax.f32 %v181_v30, 0.0 }
 0x1a7   :  { %241 = vmatmul.msk.f32.vlgmr.msra.gmra.mxu3 %vm135_vm1, %v183_v31 }
 0x22a   :  { %v215_v33 = vpop.f32.mrf.mxu3 }
 0x22b   :  { %v216_v34 = vadd.f32 %v251_v32, %v215_v33 }
 0x22d   :  { %218 = vst [vmem:[#allocation10] sm:$0xff] %v216_v34 }
 0x22e   :  { %229 = dma.vmem_to_hbm [thread:$0]  %s225_s24, 128, %s227_s27, [#allocation4]  }
 0x22f   :  { %378 = dma.done.wait [#allocation4], 128  }
 0x230   :  { %379 = vsyncadd [#allocation4], 4294967168 }
 0x231   :  { %234 = vsyncpa [#allocation3], 1 }
 0x232   :  { %235 = vsyncpa [#allocation6], 1 }
 0x233   :  { %236 = vsyncpa [#allocation9], 1 }
 0x234   :  { %237 = vsyncpa [#allocation4], 1 }

</bundles_post_ra>
